<compile_context>
chip_gen: v7x
topology: tpu7x:2x2x1
jax: 0.10.0
libtpu: 0.0.40
codegen_flags: <defaults>
</compile_context>

<pallas_src>
import functools
import math

import jax
import jax.numpy as jnp
from jax.experimental import pallas as pl
from jax.experimental.pallas import tpu as pltpu


def _round_up(x, m):
    return ((x + m - 1) // m) * m


def _leaky_relu(v):
    return jnp.where(v >= 0, v, 0.01 * v)


# ---------------------------------------------------------------------------
# Kernels
# ---------------------------------------------------------------------------

def normalize_kernel(x_ref, of32_ref, obf16_ref, *, has_norm):
    """Row-wise L2 normalize (eps=1e-12) + emit an f32 and a bf16 copy."""
    x = x_ref[...]
    if has_norm:
        ss = jnp.sum(x * x, axis=1, keepdims=True)
        # x / max(||x||, 1e-12)  ==  x * rsqrt(max(||x||^2, 1e-24))  (EUP rsqrt)
        x = x * jax.lax.rsqrt(jnp.maximum(ss, 1e-24))
    of32_ref[...] = x
    obf16_ref[...] = x.astype(jnp.bfloat16)


def sage_layer1_kernel(a_ref, x_ref, of32_ref, obf16_ref, acc_ref, *, has_act):
    """h1 = leaky_relu(A_scaled @ x); tiled reduction over src-column tiles."""
    @pl.when(pl.program_id(1) == 0)
    def _():
        acc_ref[...] = jnp.zeros_like(acc_ref)

    acc_ref[...] += jnp.dot(a_ref[...], x_ref[...],
                            preferred_element_type=jnp.float32)

    @pl.when(pl.program_id(1) == pl.num_programs(1) - 1)
    def _():
        h = acc_ref[...]
        if has_act:
            h = _leaky_relu(h)
        of32_ref[...] = h
        obf16_ref[...] = h.astype(jnp.bfloat16)


def sage_layer2_residual_kernel(a_ref, h1b_ref, xn_ref, h1f_ref, o_ref,
                                acc_ref, *, has_act):
    """out = x_norm + h1 + leaky_relu(A_scaled @ h1); residual fused in finalize."""
    @pl.when(pl.program_id(1) == 0)
    def _():
        acc_ref[...] = jnp.zeros_like(acc_ref)

    acc_ref[...] += jnp.dot(a_ref[...], h1b_ref[...],
                            preferred_element_type=jnp.float32)

    @pl.when(pl.program_id(1) == pl.num_programs(1) - 1)
    def _():
        h2 = acc_ref[...]
        if has_act:
            h2 = _leaky_relu(h2)
        o_ref[...] = xn_ref[...] + h1f_ref[...] + h2


# ---------------------------------------------------------------------------
# Wrapper
# ---------------------------------------------------------------------------

def egcn_forward(id_embedding, edge_index, weight_vector, *,
                 has_act=True, has_norm=True):
    """id_embedding: (N, D) f32; edge_index: (2, E) i32; weight_vector: (2E, 1) f32."""
    N, D = id_embedding.shape

    # Lane-dense feature width; MXU-friendly node tiling (multiples of 128/256).
    Dp = max(128, _round_up(D, 128))
    tile = min(256, _round_up(N, 128))
    N_pad = _round_up(N, tile)

    # edge_index = cat((edge_index, edge_index[[1, 0]]), dim=1)
    ei = jnp.concatenate([edge_index, edge_index[::-1]], axis=1)  # (2, 2E)
    src, dst = ei[0], ei[1]
    w = weight_vector[:, 0].astype(jnp.float32)

    # Dense degree-prescaled adjacency (scatter stays in plain-JAX glue).
    # TODO(synk): the O(N^2) dense adjacency + scatter-add has no clean Pallas
    # equivalent here; production graph sizes need a block-sparse path
    # (PrefetchScalarGridSpec driving tile occupancy) instead of this dense build.
    adj = jnp.zeros((N_pad, N_pad), jnp.float32).at[dst, src].add(w)
    deg = jnp.zeros((N_pad,), jnp.float32).at[dst].add(1.0)
    inv_deg = jnp.where(deg > 0, 1.0 / deg, 0.0)
    adj_bf16 = (adj * inv_deg[:, None]).astype(jnp.bfloat16)

    x_pad = jnp.zeros((N_pad, Dp), jnp.float32).at[:N, :D].set(
        id_embedding.astype(jnp.float32))

    cparams_1d = pltpu.CompilerParams(
        dimension_semantics=("parallel",),
        vmem_limit_bytes=32 * 1024 * 1024)
    cparams_2d = pltpu.CompilerParams(
        dimension_semantics=("parallel", "arbitrary"),
        vmem_limit_bytes=32 * 1024 * 1024)

    # --- normalize (and produce bf16 copy for the MXU) ----------------------
    xnorm_f32, xnorm_bf16 = pl.pallas_call(
        functools.partial(normalize_kernel, has_norm=has_norm),
        out_shape=(jax.ShapeDtypeStruct((N_pad, Dp), jnp.float32),
                   jax.ShapeDtypeStruct((N_pad, Dp), jnp.bfloat16)),
        grid=(N_pad // tile,),
        in_specs=[pl.BlockSpec((tile, Dp), lambda i: (i, 0))],
        out_specs=(pl.BlockSpec((tile, Dp), lambda i: (i, 0)),
                   pl.BlockSpec((tile, Dp), lambda i: (i, 0))),
        compiler_params=cparams_1d,
    )(x_pad)

    grid = (N_pad // tile, N_pad // tile)

    # --- SAGE layer 1: h1 = act(A_scaled @ x_norm) --------------------------
    h1_f32, h1_bf16 = pl.pallas_call(
        functools.partial(sage_layer1_kernel, has_act=has_act),
        out_shape=(jax.ShapeDtypeStruct((N_pad, Dp), jnp.float32),
                   jax.ShapeDtypeStruct((N_pad, Dp), jnp.bfloat16)),
        grid=grid,
        in_specs=[pl.BlockSpec((tile, tile), lambda i, k: (i, k)),   # A tile
                  pl.BlockSpec((tile, Dp), lambda i, k: (k, 0))],    # x (src rows)
        out_specs=(pl.BlockSpec((tile, Dp), lambda i, k: (i, 0)),
                   pl.BlockSpec((tile, Dp), lambda i, k: (i, 0))),
        scratch_shapes=[pltpu.VMEM((tile, Dp), jnp.float32)],
        compiler_params=cparams_2d,
    )(adj_bf16, xnorm_bf16)

    # --- SAGE layer 2 + fused residual: out = x_norm + h1 + act(A @ h1) -----
    out_pad = pl.pallas_call(
        functools.partial(sage_layer2_residual_kernel, has_act=has_act),
        out_shape=jax.ShapeDtypeStruct((N_pad, Dp), jnp.float32),
        grid=grid,
        in_specs=[pl.BlockSpec((tile, tile), lambda i, k: (i, k)),   # A tile
                  pl.BlockSpec((tile, Dp), lambda i, k: (k, 0)),     # h1 bf16 (src rows)
                  pl.BlockSpec((tile, Dp), lambda i, k: (i, 0)),     # x_norm f32 (dst rows)
                  pl.BlockSpec((tile, Dp), lambda i, k: (i, 0))],    # h1 f32 (dst rows)
        out_specs=pl.BlockSpec((tile, Dp), lambda i, k: (i, 0)),
        scratch_shapes=[pltpu.VMEM((tile, Dp), jnp.float32)],
        compiler_params=cparams_2d,
    )(adj_bf16, h1_bf16, xnorm_f32, h1_f32)

    return out_pad[:N, :D]


# ---------------------------------------------------------------------------
# Pure-JAX reference (f32) for a sanity check.
# ---------------------------------------------------------------------------

def egcn_reference(id_embedding, edge_index, weight_vector, *, has_act, has_norm):
    N, D = id_embedding.shape
    ei = jnp.concatenate([edge_index, edge_index[::-1]], axis=1)
    src, dst = ei[0], ei[1]
    w = weight_vector[:, 0].astype(jnp.float32)
    A = jnp.zeros((N, N), jnp.float32).at[dst, src].add(w)
    deg = jnp.zeros((N,), jnp.float32).at[dst].add(1.0)
    inv = jnp.where(deg > 0, 1.0 / deg, 0.0)[:, None]
    x = id_embedding.astype(jnp.float32)
    if has_norm:
        ss = jnp.sum(x * x, axis=1, keepdims=True)
        x = x * jax.lax.rsqrt(jnp.maximum(ss, 1e-24))
    h1 = (A @ x) * inv
    if has_act:
        h1 = _leaky_relu(h1)
    h2 = (A @ h1) * inv
    if has_act:
        h2 = _leaky_relu(h2)
    return x + h1 + h2


if __name__ == "__main__":
    key = jax.random.PRNGKey(0)
    num_user, num_item, dim_E = 8, 8, 32
    N = num_user + num_item
    E = 20

    k_emb, k_src, k_dst, k_w = jax.random.split(key, 4)

    # Deterministic xavier_normal_-style init: std = sqrt(2 / (fan_in + fan_out)).
    std = math.sqrt(2.0 / (N + dim_E))
    id_embedding = std * jax.random.normal(k_emb, (N, dim_E), jnp.float32)

    # user -> item edges (forward pass adds the reversed copies itself).
    src = jax.random.randint(k_src, (E,), 0, num_user, dtype=jnp.int32)
    dst = jax.random.randint(k_dst, (E,), num_user, N, dtype=jnp.int32)
    edge_index = jnp.stack([src, dst])                    # (2, E)

    # One weight per (doubled) edge, broadcast over features, as in GRCN.
    weight_vector = jax.random.uniform(k_w, (2 * E, 1), jnp.float32)

    out = egcn_forward(id_embedding, edge_index, weight_vector,
                       has_act=True, has_norm=True)
    jax.block_until_ready(out)
    assert out.shape == (N, dim_E)

    ref = egcn_reference(id_embedding, edge_index, weight_vector,
                         has_act=True, has_norm=True)
    max_err = float(jnp.max(jnp.abs(out - ref)))
    # bf16 MXU inputs (A, x) vs f32 reference: allow a loose tolerance.
    assert max_err < 5e-2, f"max abs error {max_err}"

    print("KERNEL_OK")
</pallas_src>

<mosaic_0001>
module attributes {stable_mosaic.version = 11 : i64} {
  func.func @normalize_kernel(%arg0: i32, %arg1: memref<128x128xf32, #tpu.memory_space<vmem>>, %arg2: memref<128x128xf32, #tpu.memory_space<vmem>>, %arg3: memref<128x128xbf16, #tpu.memory_space<vmem>>) attributes {dimension_semantics = [#tpu.dimension_semantics<parallel>], iteration_bounds = array<i64: 1>, scalar_prefetch = 0 : i64, scratch_operands = 0 : i64, tpu.core_type = #tpu.core_type<tc>, window_params = [{transform_indices = @transform_0, window_bounds = array<i64: 128, 128>}, {transform_indices = @transform_1, window_bounds = array<i64: 128, 128>}, {transform_indices = @transform_2, window_bounds = array<i64: 128, 128>}]} {
    %c0 = arith.constant 0 : index
    %c0_0 = arith.constant 0 : index
    %0 = vector.load %arg1[%c0, %c0_0] : memref<128x128xf32, #tpu.memory_space<vmem>>, vector<128x128xf32>
    %1 = arith.mulf %0, %0 : vector<128x128xf32>
    %cst = arith.constant dense<0.000000e+00> : vector<128xf32>
    %2 = vector.multi_reduction <add>, %1, %cst [1] : vector<128x128xf32> to vector<128xf32>
    %3 = vector.shape_cast %2 : vector<128xf32> to vector<128x1xf32>
    %cst_1 = arith.constant 1.000000e-24 : f32
    %4 = vector.broadcast %cst_1 : f32 to vector<128x1xf32>
    %5 = arith.maximumf %3, %4 : vector<128x1xf32>
    %6 = math.rsqrt %5 : vector<128x1xf32>
    %7 = vector.broadcast %6 : vector<128x1xf32> to vector<128x128xf32>
    %8 = arith.mulf %0, %7 : vector<128x128xf32>
    %c0_2 = arith.constant 0 : index
    %c0_3 = arith.constant 0 : index
    %9 = vector.load %arg2[%c0_2, %c0_3] : memref<128x128xf32, #tpu.memory_space<vmem>>, vector<128x128xf32>
    tpu.vector_store %arg2[%c0_2, %c0_3], %8 {strides = array<i32>} : memref<128x128xf32, #tpu.memory_space<vmem>>, vector<128x128xf32>,
    %10 = arith.truncf %8 : vector<128x128xf32> to vector<128x128xbf16>
    %c0_4 = arith.constant 0 : index
    %c0_5 = arith.constant 0 : index
    %11 = vector.load %arg3[%c0_4, %c0_5] : memref<128x128xbf16, #tpu.memory_space<vmem>>, vector<128x128xbf16>
    tpu.vector_store %arg3[%c0_4, %c0_5], %10 {strides = array<i32>} : memref<128x128xbf16, #tpu.memory_space<vmem>>, vector<128x128xbf16>,
    return
  }
  func.func @transform_0(%arg0: i32) -> (i32, i32) {
    %c0_i32 = arith.constant 0 : i32
    %c0_i32_0 = arith.constant 0 : i32
    return %arg0, %c0_i32 : i32, i32
  }
  func.func @transform_1(%arg0: i32) -> (i32, i32) {
    %c0_i32 = arith.constant 0 : i32
    %c0_i32_0 = arith.constant 0 : i32
    return %arg0, %c0_i32 : i32, i32
  }
  func.func @transform_2(%arg0: i32) -> (i32, i32) {
    %c0_i32 = arith.constant 0 : i32
    %c0_i32_0 = arith.constant 0 : i32
    return %arg0, %c0_i32 : i32, i32
  }
}

</mosaic_0001>

<bundles_post_ra>
// kernel: tpu_custom_call.1
= control target key start
LH: loop header
LB: loop body
LE: loop exit
PB: predicated region body
PF: predicated region fallthrough
CT: control target
= control target key end

     0   :  { %8 = vsyncpa [#allocation3], 0  ;;  %s608_s0 = inlined_call_operand.hbm [shape: f32[128,128], index: 0, kind: input, shape index: {}]   ;;  %s609_s1 = inlined_call_operand.hbm [shape: f32[128,128], index: 1, kind: output, shape index: {0}]   ;;  %s610_s2 = inlined_call_operand.hbm [shape: bf16[128,128], index: 2, kind: output, shape index: {1}]  }
   0x1   :  { %9 = vsyncpa [#allocation4], 0 }
   0x2   :  { %10 = vsyncpa [#allocation7], 0  ;;  %s457_s9 = smov [#allocation2]   ;;  %s385_s13 = scalar_lea.hbm %s608_s0, 2048 }
   0x3   :  { %s16_s10 = sshll.u32 %s457_s9, 4  ;;  %p386_p0 = scmp.ne.s32.totalorder %s608_s0, %s385_s13  ;;  %s17_s10 = int_to_ptr.vmem [resolvable:$true] %s16_s10 }
   0x4   :  { %p389_p1 = scmp.lt.u32.totalorder %s385_s13, %s608_s0 }
   0x6   :  { %p391_p2 = pnand %p389_p1, %p386_p0 }
   0x8   :  { %394 = shalt.err (!%p391_p2)
}
   0x9   :  { %s395_s18 = scalar_lea.vmem %s17_s10, 2048  ;;  %p400_p4 = scmp.lt.s32.totalorder %s17_s10, %s17_s10 }
   0xa   :  { %p396_p3 = scmp.ne.s32.totalorder %s17_s10, %s395_s18  ;;  %p401_p5 = scmp.lt.s32.totalorder %s395_s18, %s395_s18 }
   0xc   :  { %p402_p6 = por %p401_p5, %p400_p4 }
   0xe   :  { %p403_p7 = pnand %p402_p6, %p396_p3 }
  0x10   :  { %406 = shalt.err (!%p403_p7)
}
  0x11   :  { %s458_s19 = smov 128   ;;  %s459_s20 = smov 8  }
  0x12   :  { %22 = dma.hbm_to_vmem [thread:$0]  %s608_s0, 2048, %s17_s10, [#allocation3], %s458_s19, %s458_s19, %s459_s20  }
  0x13   :  { %451 = dma.done.wait [#allocation3], 2048  }
  0x14   :  { %452 = vsyncadd [#allocation3], 4294965248  ;;  %v494_v0 = vld [vmem:[#allocation2 + $0x10] sm:$0xff]  ;;  %v496_v1 = vld [vmem:[#allocation2] sm:$0xff]  ;;  %s460_s0 = smov [#allocation5]   ;;  %s461_s24 = smov [#allocation6]  }
  0x15   :  { %v498_v2 = vld [vmem:[#allocation2 + $0x18] sm:$0xff]  ;;  %v44_v3 = vmul.f32 %v494_v0, %v494_v0  ;;  %v42_v4 = vmul.f32 %v496_v1, %v496_v1  ;;  %v504_v5 = vld [vmem:[#allocation2 + $0x8] sm:$0xff]  ;;  %v512_v9 = vld [vmem:[#allocation2 + $0x20] sm:$0xff]  ;;  %s239_s23 = sshll.u32 %s460_s0, 4  ;;  %s251_s25 = sshll.u32 %s461_s24, 4  ;;  %s240_s23 = int_to_ptr.vmem [resolvable:$true] %s239_s23  ;;  %s574_s25 = int_to_ptr.vmem [resolvable:$true] %s251_s25 }
  0x16   :  { %v45_v6 = vmul.f32 %v498_v2, %v498_v2  ;;  %v43_v7 = vmul.f32 %v504_v5, %v504_v5  ;;  %v510_v8 = vld [vmem:[#allocation2 + $0x28] sm:$0xff]  ;;  %v46_v11 = vmul.f32 %v512_v9, %v512_v9  ;;  %v518_v12 = vld [vmem:[#allocation2 + $0x38] sm:$0xff]  ;;  %v520_v13 = vld [vmem:[#allocation2 + $0x30] sm:$0xff]  ;;  %s407_s26 = scalar_lea.vmem %s240_s23, 2048  ;;  %p412_p9 = scmp.lt.s32.totalorder %s240_s23, %s240_s23 }
  0x17   :  { %62 = vadd.xlane.f32.xlu1 %v44_v3  ;;  %58 = vadd.xlane.f32.xlu0 %v42_v4  ;;  %v47_v10 = vmul.f32 %v510_v8, %v510_v8  ;;  %v49_v14 = vmul.f32 %v518_v12, %v518_v12  ;;  %v48_v15 = vmul.f32 %v520_v13, %v520_v13  ;;  %v526_v16 = vld [vmem:[#allocation2 + $0x48] sm:$0xff]  ;;  %v528_v17 = vld [vmem:[#allocation2 + $0x40] sm:$0xff]  ;;  %v534_v20 = vld [vmem:[#allocation2 + $0x58] sm:$0xff]  ;;  %p408_p8 = scmp.ne.s32.totalorder %s240_s23, %s407_s26  ;;  %p413_p10 = scmp.lt.s32.totalorder %s407_s26, %s407_s26 }
  0x18   :  { %v51_v18 = vmul.f32 %v526_v16, %v526_v16  ;;  %v50_v19 = vmul.f32 %v528_v17, %v528_v17  ;;  %v536_v21 = vld [vmem:[#allocation2 + $0x50] sm:$0xff]  ;;  %v53_v22 = vmul.f32 %v534_v20, %v534_v20  ;;  %v542_v24 = vld [vmem:[#allocation2 + $0x68] sm:$0xff]  ;;  %v544_v25 = vld [vmem:[#allocation2 + $0x60] sm:$0xff] }
  0x19   :  { %v52_v23 = vmul.f32 %v536_v21, %v536_v21  ;;  %v55_v26 = vmul.f32 %v542_v24, %v542_v24  ;;  %v54_v27 = vmul.f32 %v544_v25, %v544_v25  ;;  %v550_v28 = vld [vmem:[#allocation2 + $0x78] sm:$0xff]  ;;  %v552_v29 = vld [vmem:[#allocation2 + $0x70] sm:$0xff]  ;;  %p414_p11 = por %p413_p10, %p412_p9 }
  0x1a   :  { %v57_v30 = vmul.f32 %v550_v28, %v550_v28  ;;  %v56_v31 = vmul.f32 %v552_v29, %v552_v29 }
  0x1b   :  { %64 = vadd.xlane.f32.xlu1 %v45_v6  ;;  %60 = vadd.xlane.f32.xlu0 %v43_v7  ;;  %p415_p12 = pnand %p414_p11, %p408_p8 }
  0x1f   :  { %68 = vadd.xlane.f32.xlu1 %v47_v10  ;;  %66 = vadd.xlane.f32.xlu0 %v46_v11 }
  0x23   :  { %72 = vadd.xlane.f32.xlu1 %v49_v14  ;;  %70 = vadd.xlane.f32.xlu0 %v48_v15 }
  0x27   :  { %76 = vadd.xlane.f32.xlu1 %v51_v18  ;;  %74 = vadd.xlane.f32.xlu0 %v50_v19 }
  0x2b   :  { %80 = vadd.xlane.f32.xlu1 %v53_v22  ;;  %78 = vadd.xlane.f32.xlu0 %v52_v23 }
  0x2f   :  { %84 = vadd.xlane.f32.xlu1 %v55_v26  ;;  %82 = vadd.xlane.f32.xlu0 %v54_v27 }
  0x33   :  { %88 = vadd.xlane.f32.xlu1 %v57_v30  ;;  %86 = vadd.xlane.f32.xlu0 %v56_v31 }
  0xa4   :  { %v63_v32 = vpop.xlane.xlu1 %62  ;;  %v59_v33 = vpop.xlane.xlu0 %58 }
  0xa5   :  { %v92_v34 = vmax.f32 %v63_v32, 1e-24  ;;  %v90_v35 = vmax.f32 %v59_v33, 1e-24 }
  0xa7   :  { %353 = vrsqrt.f32 %v92_v34 }
  0xa8   :  { %355 = vrsqrt.f32 %v90_v35  ;;  %v65_v36 = vpop.xlane.xlu1 %64  ;;  %v61_v37 = vpop.xlane.xlu0 %60 }
  0xa9   :  { %v93_v38 = vmax.f32 %v65_v36, 1e-24  ;;  %v91_v39 = vmax.f32 %v61_v37, 1e-24 }
  0xab   :  { %357 = vrsqrt.f32 %v93_v38 }
  0xac   :  { %359 = vrsqrt.f32 %v91_v39  ;;  %v69_v40 = vpop.xlane.xlu1 %68  ;;  %v67_v41 = vpop.xlane.xlu0 %66 }
  0xad   :  { %v95_v42 = vmax.f32 %v69_v40, 1e-24  ;;  %v94_v43 = vmax.f32 %v67_v41, 1e-24 }
  0xaf   :  { %361 = vrsqrt.f32 %v95_v42 }
  0xb0   :  { %363 = vrsqrt.f32 %v94_v43  ;;  %v73_v44 = vpop.xlane.xlu1 %72  ;;  %v71_v45 = vpop.xlane.xlu0 %70 }
  0xb1   :  { %v354_v46 = vpop.eup %353  ;;  %v97_v47 = vmax.f32 %v73_v44, 1e-24  ;;  %v96_v48 = vmax.f32 %v71_v45, 1e-24 }
  0xb2   :  { %v356_v49 = vpop.eup %355  ;;  %v124_v50 = vmul.f32 %v354_v46, %v494_v0 }
  0xb3   :  { %v122_v51 = vmul.f32 %v356_v49, %v496_v1  ;;  %365 = vrsqrt.f32 %v97_v47 }
  0xb4   :  { %140 = vst [vmem:[#allocation5 + $0x10] sm:$0xff] %v124_v50  ;;  %367 = vrsqrt.f32 %v96_v48  ;;  %v77_v52 = vpop.xlane.xlu1 %76  ;;  %v75_v53 = vpop.xlane.xlu0 %74 }
  0xb5   :  { %v358_v54 = vpop.eup %357  ;;  %138 = vst [vmem:[#allocation5] sm:$0xff] %v122_v51  ;;  %v99_v55 = vmax.f32 %v77_v52, 1e-24  ;;  %v98_v56 = vmax.f32 %v75_v53, 1e-24 }
  0xb6   :  { %v360_v57 = vpop.eup %359  ;;  %v125_v58 = vmul.f32 %v358_v54, %v498_v2 }
  0xb7   :  { %v123_v59 = vmul.f32 %v360_v57, %v504_v5  ;;  %369 = vrsqrt.f32 %v99_v55 }
  0xb8   :  { %141 = vst [vmem:[#allocation5 + $0x18] sm:$0xff] %v125_v58  ;;  %v307_v60 = vpack.c.bf16 %v125_v58, %v124_v50  ;;  %371 = vrsqrt.f32 %v98_v56  ;;  %v81_v61 = vpop.xlane.xlu1 %80  ;;  %v79_v62 = vpop.xlane.xlu0 %78 }
  0xb9   :  { %v362_v63 = vpop.eup %361  ;;  %139 = vst [vmem:[#allocation5 + $0x8] sm:$0xff] %v123_v59  ;;  %v302_v0 = vpack.c.bf16 %v123_v59, %v122_v51  ;;  %v101_v1 = vmax.f32 %v81_v61, 1e-24  ;;  %v100_v3 = vmax.f32 %v79_v62, 1e-24 }
  0xba   :  { %v364_v4 = vpop.eup %363  ;;  %339 = vst [vmem:[#allocation6 + $0x8] sm:$0xff] %v307_v60   ;;  %v127_v6 = vmul.f32 %v362_v63, %v510_v8 }
  0xbb   :  { %303 = vst [vmem:[#allocation6] sm:$0xff] %v302_v0   ;;  %v126_v2 = vmul.f32 %v364_v4, %v512_v9  ;;  %373 = vrsqrt.f32 %v101_v1 }
  0xbc   :  { %143 = vst [vmem:[#allocation5 + $0x28] sm:$0xff] %v127_v6  ;;  %375 = vrsqrt.f32 %v100_v3  ;;  %v85_v5 = vpop.xlane.xlu1 %84  ;;  %v83_v7 = vpop.xlane.xlu0 %82 }
  0xbd   :  { %v366_v10 = vpop.eup %365  ;;  %142 = vst [vmem:[#allocation5 + $0x20] sm:$0xff] %v126_v2  ;;  %v312_v11 = vpack.c.bf16 %v127_v6, %v126_v2  ;;  %v103_v14 = vmax.f32 %v85_v5, 1e-24  ;;  %v102_v15 = vmax.f32 %v83_v7, 1e-24 }
  0xbe   :  { %v368_v18 = vpop.eup %367  ;;  %v129_v19 = vmul.f32 %v366_v10, %v518_v12 }
  0xbf   :  { %340 = vst [vmem:[#allocation6 + $0x10] sm:$0xff] %v312_v11   ;;  %v128_v22 = vmul.f32 %v368_v18, %v520_v13  ;;  %377 = vrsqrt.f32 %v103_v14 }
  0xc0   :  { %145 = vst [vmem:[#allocation5 + $0x38] sm:$0xff] %v129_v19  ;;  %379 = vrsqrt.f32 %v102_v15  ;;  %v89_v8 = vpop.xlane.xlu1 %88  ;;  %v87_v9 = vpop.xlane.xlu0 %86 }
  0xc1   :  { %v370_v23 = vpop.eup %369  ;;  %144 = vst [vmem:[#allocation5 + $0x30] sm:$0xff] %v128_v22  ;;  %v317_v26 = vpack.c.bf16 %v129_v19, %v128_v22  ;;  %v105_v27 = vmax.f32 %v89_v8, 1e-24  ;;  %v104_v30 = vmax.f32 %v87_v9, 1e-24 }
  0xc2   :  { %v372_v31 = vpop.eup %371  ;;  %v131_v32 = vmul.f32 %v370_v23, %v526_v16 }
  0xc3   :  { %341 = vst [vmem:[#allocation6 + $0x18] sm:$0xff] %v317_v26   ;;  %v130_v33 = vmul.f32 %v372_v31, %v528_v17  ;;  %381 = vrsqrt.f32 %v105_v27 }
  0xc4   :  { %147 = vst [vmem:[#allocation5 + $0x48] sm:$0xff] %v131_v32  ;;  %383 = vrsqrt.f32 %v104_v30 }
  0xc5   :  { %v374_v12 = vpop.eup %373  ;;  %146 = vst [vmem:[#allocation5 + $0x40] sm:$0xff] %v130_v33  ;;  %v322_v13 = vpack.c.bf16 %v131_v32, %v130_v33 }
  0xc6   :  { %v376_v34 = vpop.eup %375  ;;  %v133_v35 = vmul.f32 %v374_v12, %v534_v20 }
  0xc7   :  { %342 = vst [vmem:[#allocation6 + $0x20] sm:$0xff] %v322_v13   ;;  %v132_v36 = vmul.f32 %v376_v34, %v536_v21 }
  0xc8   :  { %149 = vst [vmem:[#allocation5 + $0x58] sm:$0xff] %v133_v35 }
  0xc9   :  { %v378_v37 = vpop.eup %377  ;;  %148 = vst [vmem:[#allocation5 + $0x50] sm:$0xff] %v132_v36  ;;  %v327_v38 = vpack.c.bf16 %v133_v35, %v132_v36 }
  0xca   :  { %v380_v16 = vpop.eup %379  ;;  %v135_v39 = vmul.f32 %v378_v37, %v542_v24 }
  0xcb   :  { %343 = vst [vmem:[#allocation6 + $0x28] sm:$0xff] %v327_v38   ;;  %v134_v17 = vmul.f32 %v380_v16, %v544_v25 }
  0xcc   :  { %151 = vst [vmem:[#allocation5 + $0x68] sm:$0xff] %v135_v39 }
  0xcd   :  { %v382_v40 = vpop.eup %381  ;;  %150 = vst [vmem:[#allocation5 + $0x60] sm:$0xff] %v134_v17  ;;  %v332_v41 = vpack.c.bf16 %v135_v39, %v134_v17 }
  0xce   :  { %v384_v20 = vpop.eup %383  ;;  %v137_v21 = vmul.f32 %v382_v40, %v550_v28 }
  0xcf   :  { %344 = vst [vmem:[#allocation6 + $0x30] sm:$0xff] %v332_v41   ;;  %v136_v42 = vmul.f32 %v384_v20, %v552_v29 }
  0xd0   :  { %153 = vst [vmem:[#allocation5 + $0x78] sm:$0xff] %v137_v21 }
  0xd1   :  { %152 = vst [vmem:[#allocation5 + $0x70] sm:$0xff] %v136_v42  ;;  %v337_v24 = vpack.c.bf16 %v137_v21, %v136_v42 }
  0xd2   :  { %418 = shalt.err (!%p415_p12)
}
  0xd3   :  { %s419_s29 = scalar_lea.hbm %s609_s1, 2048 }
  0xd4   :  { %p420_p13 = scmp.ne.s32.totalorder %s609_s1, %s419_s29  ;;  %p423_p0 = scmp.lt.u32.totalorder %s419_s29, %s609_s1 }
  0xd6   :  { %p425_p1 = pnand %p423_p0, %p420_p13 }
  0xd8   :  { %428 = shalt.err (!%p425_p1)
}
  0xd9   :  { %245 = dma.vmem_to_hbm [thread:$0]  %s240_s23, 2048, %s609_s1, [#allocation4], %s458_s19, %s458_s19, %s459_s20   ;;  %345 = vst [vmem:[#allocation6 + $0x38] sm:$0xff] %v337_v24  }
  0xda   :  { %s429_s8 = scalar_lea.vmem %s574_s25, 1024  ;;  %p434_p3 = scmp.lt.s32.totalorder %s574_s25, %s574_s25 }
  0xdb   :  { %p430_p2 = scmp.ne.s32.totalorder %s574_s25, %s429_s8  ;;  %p435_p4 = scmp.lt.s32.totalorder %s429_s8, %s429_s8 }
  0xdd   :  { %p436_p5 = por %p435_p4, %p434_p3 }
  0xdf   :  { %p437_p6 = pnand %p436_p5, %p430_p2 }
  0xe1   :  { %440 = shalt.err (!%p437_p6)
}
  0xe2   :  { %s441_s11 = scalar_lea.hbm %s610_s2, 1024 }
  0xe3   :  { %p442_p7 = scmp.ne.s32.totalorder %s610_s2, %s441_s11  ;;  %p445_p8 = scmp.lt.u32.totalorder %s441_s11, %s610_s2 }
  0xe5   :  { %p447_p9 = pnand %p445_p8, %p442_p7 }
  0xe7   :  { %450 = shalt.err (!%p447_p9)
}
  0xe8   :  { %s462_s1 = smov 64   ;;  %s463_s16 = smov 4  }
  0xe9   :  { %257 = dma.vmem_to_hbm [thread:$0]  %s574_s25, 1024, %s610_s2, [#allocation7], %s462_s1, %s462_s1, %s463_s16  }
  0xea   :  { %453 = dma.done.wait [#allocation4], 2048  }
  0xeb   :  { %454 = vsyncadd [#allocation4], 4294965248 }
  0xec   :  { %455 = dma.done.wait [#allocation7], 1024  }
  0xed   :  { %456 = vsyncadd [#allocation7], 4294966272 }
  0xee   :  { %264 = vsyncpa [#allocation3], 1 }
  0xef   :  { %265 = vsyncpa [#allocation4], 1 }
  0xf0   :  { %266 = vsyncpa [#allocation7], 1 }

</bundles_post_ra>
